<compile_context>
chip_gen: v7x
topology: tpu7x:2x2x1
jax: 0.10.0
libtpu: 0.0.40
codegen_flags: <defaults>
</compile_context>

<pallas_src>
import functools

import jax
import jax.numpy as jnp
from jax.experimental import pallas as pl
from jax.experimental.pallas import tpu as pltpu


# ---------------------------------------------------------------------------
# Kernels
# ---------------------------------------------------------------------------

def _mlp_fused_kernel(*refs, n_hidden_layers, compute_dtype):
    """All weights resident in VMEM; one grid axis over batch tiles."""
    if n_hidden_layers > 0:
        x_ref, w1_ref, b1_ref, wh_ref, bh_ref, w2_ref, b2_ref, out_ref = refs
    else:
        x_ref, w1_ref, b1_ref, w2_ref, b2_ref, out_ref = refs

    # fc + ReLU (MXU matmul, f32 accumulation; bias/ReLU stay f32 on the VPU).
    h = jnp.dot(x_ref[...], w1_ref[...], preferred_element_type=jnp.float32)
    h = jnp.maximum(h + b1_ref[...], 0.0)

    if n_hidden_layers > 0:
        def layer(i, h):
            hi = jnp.dot(h.astype(compute_dtype), wh_ref[i],
                         preferred_element_type=jnp.float32)
            return jnp.maximum(hi + bh_ref[i], 0.0)

        if n_hidden_layers <= 8:
            # Shallow stacks: static unroll (full scheduler visibility).
            for i in range(n_hidden_layers):
                h = layer(i, h)
        else:
            # Deep stacks: real loop bounds live ranges; unroll=2 restores most
            # of the cross-layer MXU/VPU overlap.
            h = jax.lax.fori_loop(0, n_hidden_layers, layer, h, unroll=2)

    out = jnp.dot(h.astype(compute_dtype), w2_ref[...],
                  preferred_element_type=jnp.float32)
    out_ref[...] = (out + b2_ref[...]).astype(out_ref.dtype)


def _mlp_stream_kernel(x_ref, w1_ref, b1_ref, wh_ref, bh_ref, w2_ref, b2_ref,
                       out_ref, h_ref, *, compute_dtype):
    """Hidden weights streamed layer-by-layer (grid axis 1, 'arbitrary').

    Caps weight VMEM at ~2*hid^2 (double-buffered wh) so large stacks fit
    v7x's 64 MiB VMEM; the next layer's weight DMA overlaps this layer's MXU
    work. The activation h is carried across layer steps in f32 VMEM scratch.
    """
    l = pl.program_id(1)

    @pl.when(l == 0)
    def _():
        h0 = jnp.dot(x_ref[...], w1_ref[...],
                     preferred_element_type=jnp.float32)
        h_ref[...] = jnp.maximum(h0 + b1_ref[...], 0.0)

    hi = jnp.dot(h_ref[...].astype(compute_dtype), wh_ref[0],
                 preferred_element_type=jnp.float32)
    h_ref[...] = jnp.maximum(hi + bh_ref[0], 0.0)

    @pl.when(l == pl.num_programs(1) - 1)
    def _():
        out = jnp.dot(h_ref[...].astype(compute_dtype), w2_ref[...],
                      preferred_element_type=jnp.float32)
        out_ref[...] = (out + b2_ref[...]).astype(out_ref.dtype)


# ---------------------------------------------------------------------------
# Helpers
# ---------------------------------------------------------------------------

def _round_up(x, m):
    return (x + m - 1) // m * m


def _cdiv(a, b):
    return -(-a // b)


def _pad(a, shape, dtype):
    """Zero-pad `a` into a `shape` array of `dtype` (top-left corner)."""
    out = jnp.zeros(shape, dtype)
    return out.at[tuple(slice(0, s) for s in a.shape)].set(a.astype(dtype))


def _vmem_budget():
    """Per-generation VMEM budget: chip capacity minus ~8 MiB headroom
    (~56 MiB on v7x, ~120 MiB on v5e/v6e). Conservative fallback if the
    hardware query is unavailable."""
    try:
        cap = int(pltpu.get_tpu_info().vmem_capacity_bytes)
    except Exception:
        cap = 64 << 20
    return max(24 << 20, cap - (8 << 20))


def prepare_params(params, *, compute_dtype=jnp.bfloat16):
    """Pad + cast weights once (cacheable across forward calls).

    Weights are (in, out) [transposed vs PyTorch]. Feature dims of the hidden/
    output side are lane-padded to 128 (unmasked vst on the output); the fc1
    contraction dim (input_dim) is only sublane-padded to 16, which keeps x's
    streamed DMA small for small input_dim. Zero padding is numerically exact.
    """
    w1, b1, wh, bh, w2, b2 = params
    input_dim, hidden_dim = w1.shape
    out_dim = w2.shape[-1]
    nh = int(wh.shape[0])

    in_p = _round_up(input_dim, 16)     # K of fc1: sublane alignment only
    hid_p = _round_up(hidden_dim, 128)  # lane-dense
    out_p = _round_up(out_dim, 128)     # lane-dense output stores

    prep = {
        "compute_dtype": compute_dtype,
        "input_dim": input_dim, "hidden_dim": hidden_dim, "out_dim": out_dim,
        "n_hidden_layers": nh, "in_p": in_p, "hid_p": hid_p, "out_p": out_p,
        "w1": _pad(w1, (in_p, hid_p), compute_dtype),
        "b1": _pad(jnp.reshape(b1, (1, -1)), (1, hid_p), jnp.float32),
        "w2": _pad(w2, (hid_p, out_p), compute_dtype),
        "b2": _pad(jnp.reshape(b2, (1, -1)), (1, out_p), jnp.float32),
    }
    if nh > 0:
        prep["wh"] = _pad(wh, (nh, hid_p, hid_p), compute_dtype)
        prep["bh"] = _pad(jnp.reshape(bh, (nh, 1, -1)), (nh, 1, hid_p),
                          jnp.float32)
    return prep


# ---------------------------------------------------------------------------
# Forward
# ---------------------------------------------------------------------------

def matrix_predictor_forward(x, params, *, output_rows, output_cols,
                             n_hidden_layers=None, batch_tile=None,
                             compute_dtype=jnp.bfloat16, force_stream=False):
    """Runs the fused MLP Pallas kernel and reshapes to (-1, R, C).

    `params` is either the raw tuple from init_params() or the dict returned by
    prepare_params() (preferred: pad/cast the weights once, reuse per call).
    """
    prep = params if isinstance(params, dict) else prepare_params(
        params, compute_dtype=compute_dtype)

    B, input_dim = x.shape
    assert input_dim == prep["input_dim"], (input_dim, prep["input_dim"])
    nh = prep["n_hidden_layers"]
    if n_hidden_layers is not None:
        assert n_hidden_layers == nh, (n_hidden_layers, nh)

    in_p, hid_p, out_p = prep["in_p"], prep["hid_p"], prep["out_p"]
    out_dim = prep["out_dim"]
    cdt = prep["compute_dtype"]
    out_dtype = x.dtype
    cbytes = jnp.dtype(cdt).itemsize
    obytes = jnp.dtype(out_dtype).itemsize

    budget = _vmem_budget()

    # ---- batch tile: 16-aligned, balanced across steps, >=2 steps if possible
    B_al = _round_up(B, 16)
    if batch_tile is None:
        n_steps = _cdiv(B_al, 256)
        if n_steps == 1 and B_al >= 32:
            n_steps = 2          # >= 2 grid steps lets v7x shard across 2 TCs
        bt = _round_up(_cdiv(B_al, n_steps), 16)
    else:
        bt = min(max(16, _round_up(int(batch_tile), 16)), B_al)

    # ---- fused (weights resident) vs layer-streamed hidden stack
    fused_w_bytes = ((in_p * hid_p + hid_p * out_p + nh * hid_p * hid_p)
                     * cbytes + ((1 + nh) * hid_p + out_p) * 4)
    stream = nh > 0 and (force_stream or fused_w_bytes > (budget * 2) // 3)

    def fused_bytes(t):
        io = 2 * t * (in_p * cbytes + out_p * obytes)
        act = 4 * t * hid_p * 4
        return fused_w_bytes + io + act

    def stream_bytes(t):
        w = ((in_p * hid_p + hid_p * out_p + 2 * hid_p * hid_p) * cbytes
             + (hid_p + out_p + 2 * hid_p) * 4)
        io = 2 * t * (in_p * cbytes + out_p * obytes)
        act = 4 * t * hid_p * 4        # h scratch + working intermediates
        return w + io + act

    est_fn = stream_bytes if stream else fused_bytes
    # VMEM-aware tile: shrink until the resident footprint fits the budget.
    while bt > 16 and est_fn(bt) > budget:
        bt = max(16, _round_up(bt // 2, 16))

    B_p = _round_up(B, bt)
    nb = B_p // bt

    # Zero-pad + cast the (only streamed) activation input once per call.
    xp = _pad(x, (B_p, in_p), cdt)

    vmem_limit = int(min(max(est_fn(bt) + (4 << 20), 32 << 20), budget))

    # Advisory cost estimate so XLA schedules the wrapper pad/slice around it.
    flops = 2 * B_p * (in_p * hid_p + nh * hid_p * hid_p + hid_p * out_p)
    weight_hbm = fused_w_bytes
    if stream:
        weight_hbm += (nb - 1) * nh * hid_p * hid_p * cbytes  # wh per batch step
    cost = pl.CostEstimate(
        flops=int(flops), transcendentals=0,
        bytes_accessed=int(weight_hbm + B_p * in_p * cbytes
                           + B_p * out_p * obytes))

    single = pl.Buffered(1)   # constant-index resident operands

    if not stream:
        grid = (nb,)
        const2 = lambda i: (0, 0)
        const3 = lambda i: (0, 0, 0)
        in_specs = [
            pl.BlockSpec((bt, in_p), lambda i: (i, 0)),
            pl.BlockSpec((in_p, hid_p), const2, pipeline_mode=single),
            pl.BlockSpec((1, hid_p), const2, pipeline_mode=single),
        ]
        args = [xp, prep["w1"], prep["b1"]]
        if nh > 0:
            in_specs += [
                pl.BlockSpec((nh, hid_p, hid_p), const3, pipeline_mode=single),
                pl.BlockSpec((nh, 1, hid_p), const3, pipeline_mode=single),
            ]
            args += [prep["wh"], prep["bh"]]
        in_specs += [
            pl.BlockSpec((hid_p, out_p), const2, pipeline_mode=single),
            pl.BlockSpec((1, out_p), const2, pipeline_mode=single),
        ]
        args += [prep["w2"], prep["b2"]]
        out_specs = pl.BlockSpec((bt, out_p), lambda i: (i, 0))
        scratch = []
        dims = ("parallel",)
        kernel = functools.partial(_mlp_fused_kernel, n_hidden_layers=nh,
                                   compute_dtype=cdt)
    else:
        grid = (nb, nh)
        in_specs = [
            pl.BlockSpec((bt, in_p), lambda i, l: (i, 0)),
            pl.BlockSpec((in_p, hid_p), lambda i, l: (0, 0),
                         pipeline_mode=single),
            pl.BlockSpec((1, hid_p), lambda i, l: (0, 0),
                         pipeline_mode=single),
            # Per-layer hidden weight/bias: streamed + double-buffered.
            pl.BlockSpec((1, hid_p, hid_p), lambda i, l: (l, 0, 0)),
            pl.BlockSpec((1, 1, hid_p), lambda i, l: (l, 0, 0)),
            pl.BlockSpec((hid_p, out_p), lambda i, l: (0, 0),
                         pipeline_mode=single),
            pl.BlockSpec((1, out_p), lambda i, l: (0, 0),
                         pipeline_mode=single),
        ]
        args = [xp, prep["w1"], prep["b1"], prep["wh"], prep["bh"],
                prep["w2"], prep["b2"]]
        out_specs = pl.BlockSpec((bt, out_p), lambda i, l: (i, 0))
        scratch = [pltpu.VMEM((bt, hid_p), jnp.float32)]
        dims = ("parallel", "arbitrary")
        kernel = functools.partial(_mlp_stream_kernel, compute_dtype=cdt)

    out_flat = pl.pallas_call(
        kernel,
        out_shape=jax.ShapeDtypeStruct((B_p, out_p), out_dtype),
        grid_spec=pltpu.PrefetchScalarGridSpec(
            num_scalar_prefetch=0,
            grid=grid,
            in_specs=in_specs,
            out_specs=out_specs,
            scratch_shapes=scratch),
        compiler_params=pltpu.CompilerParams(
            dimension_semantics=dims,
            vmem_limit_bytes=vmem_limit),
        cost_estimate=cost,
    )(*args)

    # Strip batch/lane padding, then output.view(-1, R, C).
    return out_flat[:B, :out_dim].reshape(-1, output_rows, output_cols)


# ---------------------------------------------------------------------------
# Init + reference
# ---------------------------------------------------------------------------

def init_params(key, input_dim, hidden_dim, output_rows, output_cols,
                n_hidden_layers, std=0.02, dtype=jnp.float32):
    """N(0, std^2) weights, zero biases (like init_weights()).
    Weights stored transposed vs PyTorch: (in, out)."""
    out_dim = output_rows * output_cols
    k1, k2, k3 = jax.random.split(key, 3)
    w1 = (std * jax.random.normal(k1, (input_dim, hidden_dim))).astype(dtype)
    b1 = jnp.zeros((1, hidden_dim), dtype)
    wh = (std * jax.random.normal(
        k2, (n_hidden_layers, hidden_dim, hidden_dim))).astype(dtype)
    bh = jnp.zeros((n_hidden_layers, 1, hidden_dim), dtype)
    w2 = (std * jax.random.normal(k3, (hidden_dim, out_dim))).astype(dtype)
    b2 = jnp.zeros((1, out_dim), dtype)
    return w1, b1, wh, bh, w2, b2


def _reference_forward(x, params, output_rows, output_cols, n_hidden_layers):
    w1, b1, wh, bh, w2, b2 = params
    hp = jax.lax.Precision.HIGHEST
    h = jnp.maximum(jnp.dot(x, w1, precision=hp) + b1, 0.0)
    for i in range(n_hidden_layers):
        h = jnp.maximum(jnp.dot(h, wh[i], precision=hp) + bh[i], 0.0)
    out = jnp.dot(h, w2, precision=hp) + b2
    return out.reshape(-1, output_rows, output_cols)


# ---------------------------------------------------------------------------
# Tests
# ---------------------------------------------------------------------------

if __name__ == "__main__":
    key = jax.random.PRNGKey(0)
    kx, kp, kx2, kp2, kx3, kp3 = jax.random.split(key, 6)

    # --- Test 1: f32 compute path, prepared-params reuse ---
    B, D_in, H, R, C, NH = 16, 16, 32, 4, 8, 1
    x = jax.random.normal(kx, (B, D_in), dtype=jnp.float32)
    params = init_params(kp, D_in, H, R, C, NH, std=0.1)
    ref = _reference_forward(x, params, R, C, NH)

    prep_f32 = prepare_params(params, compute_dtype=jnp.float32)
    out = jax.block_until_ready(matrix_predictor_forward(
        x, prep_f32, output_rows=R, output_cols=C))
    assert out.shape == (B, R, C), out.shape
    assert jnp.allclose(out, ref, atol=1e-3, rtol=3e-2)

    # --- Test 2: bf16 MXU operands, f32 accumulation (default fast path) ---
    prep_bf16 = prepare_params(params, compute_dtype=jnp.bfloat16)
    out_bf16 = jax.block_until_ready(matrix_predictor_forward(
        x, prep_bf16, output_rows=R, output_cols=C))
    assert out_bf16.shape == (B, R, C), out_bf16.shape
    assert jnp.allclose(out_bf16, ref, atol=2e-3, rtol=5e-2)

    # --- Test 3: n_hidden_layers == 0, batch not a multiple of 16, raw params ---
    B3, D3, H3, R3, C3 = 13, 24, 48, 3, 5
    x3 = jax.random.normal(kx2, (B3, D3), dtype=jnp.float32)
    params3 = init_params(kp2, D3, H3, R3, C3, 0, std=0.1)
    out3 = jax.block_until_ready(matrix_predictor_forward(
        x3, params3, output_rows=R3, output_cols=C3))
    ref3 = _reference_forward(x3, params3, R3, C3, 0)
    assert out3.shape == (B3, R3, C3), out3.shape
    assert jnp.allclose(out3, ref3, atol=2e-3, rtol=5e-2)

    # --- Test 4: deep stack (fori_loop unroll=2), multi-step batch grid ---
    NH4, B4 = 9, 40
    x4 = jax.random.normal(kx3, (B4, D_in), dtype=jnp.float32)
    params4 = init_params(kp3, D_in, H, R, C, NH4, std=0.25)
    prep4 = prepare_params(params4, compute_dtype=jnp.float32)
    out4 = jax.block_until_ready(matrix_predictor_forward(
        x4, prep4, output_rows=R, output_cols=C))
    ref4 = _reference_forward(x4, params4, R, C, NH4)
    assert out4.shape == (B4, R, C), out4.shape
    assert jnp.allclose(out4, ref4, atol=1e-3, rtol=3e-2)

    # --- Test 5: layer-streaming path (v7x big-stack fallback), forced ---
    out5 = jax.block_until_ready(matrix_predictor_forward(
        x4, prep4, output_rows=R, output_cols=C, force_stream=True))
    assert out5.shape == (B4, R, C), out5.shape
    assert jnp.allclose(out5, ref4, atol=1e-3, rtol=3e-2)

    print("KERNEL_OK")
</pallas_src>

<mosaic_0001>
module attributes {stable_mosaic.version = 11 : i64} {
  func.func @_mlp_fused_kernel(%arg0: i32, %arg1: memref<16x16xf32, #tpu.memory_space<vmem>>, %arg2: memref<16x128xf32, #tpu.memory_space<vmem>>, %arg3: memref<1x128xf32, #tpu.memory_space<vmem>>, %arg4: memref<1x128x128xf32, #tpu.memory_space<vmem>>, %arg5: memref<1x1x128xf32, #tpu.memory_space<vmem>>, %arg6: memref<128x128xf32, #tpu.memory_space<vmem>>, %arg7: memref<1x128xf32, #tpu.memory_space<vmem>>, %arg8: memref<16x128xf32, #tpu.memory_space<vmem>>) attributes {dimension_semantics = [#tpu.dimension_semantics<parallel>], iteration_bounds = array<i64: 1>, scalar_prefetch = 0 : i64, scratch_operands = 0 : i64, tpu.core_type = #tpu.core_type<tc>, window_params = [{transform_indices = @transform_0, window_bounds = array<i64: 16, 16>}, {pipeline_mode = #tpu.pipeline_mode<synchronous>, transform_indices = @transform_1, window_bounds = array<i64: 16, 128>}, {pipeline_mode = #tpu.pipeline_mode<synchronous>, transform_indices = @transform_2, window_bounds = array<i64: 1, 128>}, {pipeline_mode = #tpu.pipeline_mode<synchronous>, transform_indices = @transform_3, window_bounds = array<i64: 1, 128, 128>}, {pipeline_mode = #tpu.pipeline_mode<synchronous>, transform_indices = @transform_4, window_bounds = array<i64: 1, 1, 128>}, {pipeline_mode = #tpu.pipeline_mode<synchronous>, transform_indices = @transform_5, window_bounds = array<i64: 128, 128>}, {pipeline_mode = #tpu.pipeline_mode<synchronous>, transform_indices = @transform_6, window_bounds = array<i64: 1, 128>}, {transform_indices = @transform_7, window_bounds = array<i64: 16, 128>}]} {
    %c0 = arith.constant 0 : index
    %c0_0 = arith.constant 0 : index
    %0 = vector.load %arg1[%c0, %c0_0] : memref<16x16xf32, #tpu.memory_space<vmem>>, vector<16x16xf32>
    %c0_1 = arith.constant 0 : index
    %c0_2 = arith.constant 0 : index
    %1 = vector.load %arg2[%c0_1, %c0_2] : memref<16x128xf32, #tpu.memory_space<vmem>>, vector<16x128xf32>
    %cst = arith.constant dense<0.000000e+00> : vector<16x128xf32>
    %2 = tpu.matmul %0, %1, %cst {dimension_numbers = #tpu.dot_dimension_numbers<[1], [0], [0], [1], [0, 0, 1, 1], [], []>} : vector<16x16xf32>, vector<16x128xf32>, vector<16x128xf32> -> vector<16x128xf32>
    %c0_3 = arith.constant 0 : index
    %c0_4 = arith.constant 0 : index
    %3 = vector.load %arg3[%c0_3, %c0_4] : memref<1x128xf32, #tpu.memory_space<vmem>>, vector<1x128xf32>
    %4 = vector.broadcast %3 : vector<1x128xf32> to vector<16x128xf32>
    %5 = arith.addf %2, %4 : vector<16x128xf32>
    %cst_5 = arith.constant 0.000000e+00 : f32
    %6 = vector.broadcast %cst_5 : f32 to vector<16x128xf32>
    %7 = arith.maximumf %5, %6 : vector<16x128xf32>
    %c0_6 = arith.constant 0 : index
    %c0_7 = arith.constant 0 : index
    %c0_8 = arith.constant 0 : index
    %8 = vector.load %arg4[%c0_6, %c0_7, %c0_8] : memref<1x128x128xf32, #tpu.memory_space<vmem>>, vector<1x128x128xf32>
    %9 = vector.shape_cast %8 : vector<1x128x128xf32> to vector<128x128xf32>
    %cst_9 = arith.constant dense<0.000000e+00> : vector<16x128xf32>
    %10 = tpu.matmul %7, %9, %cst_9 {dimension_numbers = #tpu.dot_dimension_numbers<[1], [0], [0], [1], [0, 0, 1, 1], [], []>} : vector<16x128xf32>, vector<128x128xf32>, vector<16x128xf32> -> vector<16x128xf32>
    %c0_10 = arith.constant 0 : index
    %c0_11 = arith.constant 0 : index
    %c0_12 = arith.constant 0 : index
    %11 = vector.load %arg5[%c0_10, %c0_11, %c0_12] : memref<1x1x128xf32, #tpu.memory_space<vmem>>, vector<1x1x128xf32>
    %12 = vector.shape_cast %11 : vector<1x1x128xf32> to vector<1x128xf32>
    %13 = vector.broadcast %12 : vector<1x128xf32> to vector<16x128xf32>
    %14 = arith.addf %10, %13 : vector<16x128xf32>
    %cst_13 = arith.constant 0.000000e+00 : f32
    %15 = vector.broadcast %cst_13 : f32 to vector<16x128xf32>
    %16 = arith.maximumf %14, %15 : vector<16x128xf32>
    %c0_14 = arith.constant 0 : index
    %c0_15 = arith.constant 0 : index
    %17 = vector.load %arg6[%c0_14, %c0_15] : memref<128x128xf32, #tpu.memory_space<vmem>>, vector<128x128xf32>
    %cst_16 = arith.constant dense<0.000000e+00> : vector<16x128xf32>
    %18 = tpu.matmul %16, %17, %cst_16 {dimension_numbers = #tpu.dot_dimension_numbers<[1], [0], [0], [1], [0, 0, 1, 1], [], []>} : vector<16x128xf32>, vector<128x128xf32>, vector<16x128xf32> -> vector<16x128xf32>
    %c0_17 = arith.constant 0 : index
    %c0_18 = arith.constant 0 : index
    %19 = vector.load %arg7[%c0_17, %c0_18] : memref<1x128xf32, #tpu.memory_space<vmem>>, vector<1x128xf32>
    %20 = vector.broadcast %19 : vector<1x128xf32> to vector<16x128xf32>
    %21 = arith.addf %18, %20 : vector<16x128xf32>
    %c0_19 = arith.constant 0 : index
    %c0_20 = arith.constant 0 : index
    %22 = vector.load %arg8[%c0_19, %c0_20] : memref<16x128xf32, #tpu.memory_space<vmem>>, vector<16x128xf32>
    tpu.vector_store %arg8[%c0_19, %c0_20], %21 {strides = array<i32>} : memref<16x128xf32, #tpu.memory_space<vmem>>, vector<16x128xf32>,
    return
  }
  func.func @transform_0(%arg0: i32) -> (i32, i32) {
    %c0_i32 = arith.constant 0 : i32
    %c0_i32_0 = arith.constant 0 : i32
    return %arg0, %c0_i32 : i32, i32
  }
  func.func @transform_1(%arg0: i32) -> (i32, i32) {
    %c0_i32 = arith.constant 0 : i32
    %c0_i32_0 = arith.constant 0 : i32
    %c0_i32_1 = arith.constant 0 : i32
    return %c0_i32, %c0_i32_0 : i32, i32
  }
  func.func @transform_2(%arg0: i32) -> (i32, i32) {
    %c0_i32 = arith.constant 0 : i32
    %c0_i32_0 = arith.constant 0 : i32
    %c0_i32_1 = arith.constant 0 : i32
    return %c0_i32, %c0_i32_0 : i32, i32
  }
  func.func @transform_3(%arg0: i32) -> (i32, i32, i32) {
    %c0_i32 = arith.constant 0 : i32
    %c0_i32_0 = arith.constant 0 : i32
    %c0_i32_1 = arith.constant 0 : i32
    %c0_i32_2 = arith.constant 0 : i32
    return %c0_i32, %c0_i32_0, %c0_i32_1 : i32, i32, i32
  }
  func.func @transform_4(%arg0: i32) -> (i32, i32, i32) {
    %c0_i32 = arith.constant 0 : i32
    %c0_i32_0 = arith.constant 0 : i32
    %c0_i32_1 = arith.constant 0 : i32
    %c0_i32_2 = arith.constant 0 : i32
    return %c0_i32, %c0_i32_0, %c0_i32_1 : i32, i32, i32
  }
  func.func @transform_5(%arg0: i32) -> (i32, i32) {
    %c0_i32 = arith.constant 0 : i32
    %c0_i32_0 = arith.constant 0 : i32
    %c0_i32_1 = arith.constant 0 : i32
    return %c0_i32, %c0_i32_0 : i32, i32
  }
  func.func @transform_6(%arg0: i32) -> (i32, i32) {
    %c0_i32 = arith.constant 0 : i32
    %c0_i32_0 = arith.constant 0 : i32
    %c0_i32_1 = arith.constant 0 : i32
    return %c0_i32, %c0_i32_0 : i32, i32
  }
  func.func @transform_7(%arg0: i32) -> (i32, i32) {
    %c0_i32 = arith.constant 0 : i32
    %c0_i32_0 = arith.constant 0 : i32
    return %arg0, %c0_i32 : i32, i32
  }
}

</mosaic_0001>

<bundles_post_ra>
// kernel: tpu_custom_call.1
= control target key start
LH: loop header
LB: loop body
LE: loop exit
PB: predicated region body
PF: predicated region fallthrough
CT: control target
= control target key end

     0   :  { %12 = vsyncpa [#allocation3], 0  ;;  %s858_s0 = inlined_call_operand.hbm [shape: f32[16,16], index: 0, kind: input, shape index: {}]   ;;  %s859_s1 = inlined_call_operand.hbm [shape: f32[16,128], index: 1, kind: input, shape index: {}]   ;;  %s860_s2 = inlined_call_operand.vmem [shape: f32[1,128], index: 2, kind: input, shape index: {}]   ;;  %s861_s3 = inlined_call_operand.hbm [shape: f32[1,128,128], index: 3, kind: input, shape index: {}]   ;;  %s862_s4 = inlined_call_operand.vmem [shape: f32[1,1,128], index: 4, kind: input, shape index: {}]   ;;  %s863_s5 = inlined_call_operand.hbm [shape: f32[128,128], index: 5, kind: input, shape index: {}]   ;;  %s864_s6 = inlined_call_operand.vmem [shape: f32[1,128], index: 6, kind: input, shape index: {}]   ;;  %s865_s7 = inlined_call_operand.hbm [shape: f32[16,128], index: 7, kind: output, shape index: {}]  }
   0x1   :  { %13 = vsyncpa [#allocation6], 0 }
   0x2   :  { %14 = vsyncpa [#allocation9], 0 }
   0x3   :  { %15 = vsyncpa [#allocation4], 0  ;;  %s711_s24 = smov [#allocation5]   ;;  %s712_s26 = smov [#allocation2]  }
   0x4   :  { %s33_s25 = sshll.u32 %s711_s24, 4  ;;  %s21_s27 = sshll.u32 %s712_s26, 4  ;;  %s34_s25 = int_to_ptr.vmem [resolvable:$true] %s33_s25  ;;  %s758_s27 = int_to_ptr.vmem [resolvable:$true] %s21_s27 }
   0x5   :  { %s593_s30 = scalar_lea.hbm %s859_s1, 256 }
   0x6   :  { %p594_p0 = scmp.ne.s32.totalorder %s859_s1, %s593_s30  ;;  %p597_p1 = scmp.lt.u32.totalorder %s593_s30, %s859_s1 }
   0x8   :  { %p599_p2 = pnand %p597_p1, %p594_p0 }
   0xa   :  { %602 = shalt.err (!%p599_p2)
}
   0xb   :  { %s603_s12 = scalar_lea.vmem %s34_s25, 256  ;;  %p608_p4 = scmp.lt.s32.totalorder %s34_s25, %s34_s25 }
   0xc   :  { %p604_p3 = scmp.ne.s32.totalorder %s34_s25, %s603_s12  ;;  %p609_p5 = scmp.lt.s32.totalorder %s603_s12, %s603_s12 }
   0xe   :  { %p610_p6 = por %p609_p5, %p608_p4 }
  0x10   :  { %p611_p7 = pnand %p610_p6, %p604_p3 }
  0x12   :  { %614 = shalt.err (!%p611_p7)
}
  0x13   :  { %s713_s13 = smov 128   ;;  %s714_s14 = smov 8  }
  0x14   :  { %39 = dma.hbm_to_vmem [thread:$0]  %s859_s1, 256, %s34_s25, [#allocation6], %s713_s13, %s713_s13, %s714_s14  }
  0x15   :  { %s615_s19 = scalar_lea.hbm %s858_s0, 256 }
  0x16   :  { %p616_p8 = scmp.ne.s32.totalorder %s858_s0, %s615_s19  ;;  %p619_p9 = scmp.lt.u32.totalorder %s615_s19, %s858_s0 }
  0x18   :  { %p621_p10 = pnand %p619_p9, %p616_p8 }
  0x1a   :  { %624 = shalt.err (!%p621_p10)
}
  0x1b   :  { %s625_s24 = scalar_lea.vmem %s758_s27, 256  ;;  %p630_p12 = scmp.lt.s32.totalorder %s758_s27, %s758_s27 }
  0x1c   :  { %p626_p11 = scmp.ne.s32.totalorder %s758_s27, %s625_s24  ;;  %p631_p13 = scmp.lt.s32.totalorder %s625_s24, %s625_s24 }
  0x1e   :  { %p632_p0 = por %p631_p13, %p630_p12 }
  0x20   :  { %p633_p1 = pnand %p632_p0, %p626_p11 }
  0x22   :  { %636 = shalt.err (!%p633_p1)
}
  0x23   :  { %27 = dma.hbm_to_vmem [thread:$0]  %s858_s0, 256, %s758_s27, [#allocation3], %s713_s13, %s713_s13, %s714_s14  }
  0x24   :  { %s715_s26 = smov [#allocation7]   ;;  %s716_s29 = smov [#allocation8]  }
  0x25   :  { %s47_s28 = sshll.u32 %s715_s26, 4  ;;  %s61_s30 = sshll.u32 %s716_s29, 4  ;;  %s48_s28 = int_to_ptr.vmem [resolvable:$true] %s47_s28  ;;  %s795_s30 = int_to_ptr.vmem [resolvable:$true] %s61_s30 }
  0x26   :  { %s637_s10 = scalar_lea.hbm %s861_s3, 2048 }
  0x27   :  { %p638_p2 = scmp.ne.s32.totalorder %s861_s3, %s637_s10  ;;  %p641_p3 = scmp.lt.u32.totalorder %s637_s10, %s861_s3 }
  0x29   :  { %p643_p4 = pnand %p641_p3, %p638_p2 }
  0x2b   :  { %646 = shalt.err (!%p643_p4)
}
  0x2c   :  { %s647_s0 = scalar_lea.vmem %s48_s28, 2048  ;;  %p652_p6 = scmp.lt.s32.totalorder %s48_s28, %s48_s28 }
  0x2d   :  { %p648_p5 = scmp.ne.s32.totalorder %s48_s28, %s647_s0  ;;  %p653_p7 = scmp.lt.s32.totalorder %s647_s0, %s647_s0 }
  0x2f   :  { %p654_p8 = por %p653_p7, %p652_p6 }
  0x31   :  { %p655_p9 = pnand %p654_p8, %p648_p5 }
  0x33   :  { %658 = shalt.err (!%p655_p9)
}
  0x34   :  { %53 = dma.hbm_to_vmem [thread:$0]  %s861_s3, 2048, %s48_s28, [#allocation6], %s713_s13, %s713_s13, %s714_s14  }
  0x35   :  { %s659_s20 = scalar_lea.hbm %s863_s5, 2048 }
  0x36   :  { %p660_p10 = scmp.ne.s32.totalorder %s863_s5, %s659_s20  ;;  %p663_p11 = scmp.lt.u32.totalorder %s659_s20, %s863_s5 }
  0x38   :  { %p665_p12 = pnand %p663_p11, %p660_p10 }
  0x3a   :  { %668 = shalt.err (!%p665_p12)
}
  0x3b   :  { %s669_s1 = scalar_lea.vmem %s795_s30, 2048  ;;  %p674_p0 = scmp.lt.s32.totalorder %s795_s30, %s795_s30 }
  0x3c   :  { %p670_p13 = scmp.ne.s32.totalorder %s795_s30, %s669_s1  ;;  %p675_p1 = scmp.lt.s32.totalorder %s669_s1, %s669_s1 }
  0x3e   :  { %p676_p2 = por %p675_p1, %p674_p0 }
  0x40   :  { %p677_p3 = pnand %p676_p2, %p670_p13 }
  0x42   :  { %680 = shalt.err (!%p677_p3)
}
  0x43   :  { %67 = dma.hbm_to_vmem [thread:$0]  %s863_s5, 2048, %s795_s30, [#allocation9], %s713_s13, %s713_s13, %s714_s14  }
  0x44   :  { %703 = dma.done.wait [#allocation3], 256  }
  0x45   :  { %704 = vsyncadd [#allocation3], 4294967040 }
  0x46   :  { %705 = dma.done.wait [#allocation6], 2304  }
  0x47   :  { %706 = vsyncadd [#allocation6], 4294964992 }
  0x48   :  { %707 = dma.done.wait [#allocation9], 2048  }
  0x49   :  { %708 = vsyncadd [#allocation9], 4294965248  ;;  %vm93_vm0 = vcmask 130048   ;;  %v84_v0 = vld [vmem:[#allocation5] sm:$0xff]  ;;  %v85_v1 = vld [vmem:[#allocation5 + $0x8] sm:$0xff]  ;;  %s717_s8 = smov [#allocation10]  }
  0x4a   :  { %v82_v2 = vld [vmem:[#allocation2] sm:$0xff]  ;;  %v518_v3 = vpack.c.bf16 %v85_v1, %v84_v0  ;;  %v178_v5 = vld [vmem:[#allocation7 + $0x8] sm:$0xff]  ;;  %v179_v7 = vld [vmem:[#allocation7 + $0x10] sm:$0xff]  ;;  %s382_s9 = sshll.u32 %s717_s8, 4  ;;  %s383_s9 = int_to_ptr.vmem [resolvable:$true] %s382_s9 }
  0x4b   :  { %445 = vmatprep.mubr.msk.f32.mxu0 %vm93_vm0, %v82_v2  ;;  %v177_v4 = vld [vmem:[#allocation7] sm:$0xff]  ;;  %v180_v8 = vld [vmem:[#allocation7 + $0x18] sm:$0xff]  ;;  %v182_v11 = vld [vmem:[#allocation7 + $0x28] sm:$0xff]  ;;  %p686_p5 = scmp.lt.s32.totalorder %s383_s9, %s383_s9 }
  0x4c   :  { %v522_v6 = vpack.c.bf16 %v178_v5, %v177_v4  ;;  %519 = vmatprep.subr.bf16.mxu0 %v518_v3  ;;  %v526_v9 = vpack.c.bf16 %v180_v8, %v179_v7  ;;  %v181_v10 = vld [vmem:[#allocation7 + $0x20] sm:$0xff]  ;;  %v83_v12 = vld [vmem:[#allocation2 + $0x8] sm:$0xff]  ;;  %v183_v14 = vld [vmem:[#allocation7 + $0x30] sm:$0xff] }
  0x4d   :  { %521 = vmatpush3.bf16.msra.mxu0 %v518_v3  ;;  %v530_v13 = vpack.c.bf16 %v182_v11, %v181_v10  ;;  %v184_v15 = vld [vmem:[#allocation7 + $0x38] sm:$0xff]  ;;  %v185_v17 = vld [vmem:[#allocation7 + $0x40] sm:$0xff]  ;;  %v186_v18 = vld [vmem:[#allocation7 + $0x48] sm:$0xff] }
  0x4e   :  { %523 = vmatprep.subr.bf16.mxu1 %v522_v6  ;;  %v534_v16 = vpack.c.bf16 %v184_v15, %v183_v14  ;;  %v538_v19 = vpack.c.bf16 %v186_v18, %v185_v17  ;;  %v187_v20 = vld [vmem:[#allocation7 + $0x50] sm:$0xff]  ;;  %v188_v21 = vld [vmem:[#allocation7 + $0x58] sm:$0xff]  ;;  %v189_v23 = vld [vmem:[#allocation7 + $0x60] sm:$0xff] }
  0x4f   :  { %525 = vmatpush3.bf16.msra.mxu1 %v522_v6  ;;  %v542_v22 = vpack.c.bf16 %v188_v21, %v187_v20  ;;  %v190_v24 = vld [vmem:[#allocation7 + $0x68] sm:$0xff]  ;;  %v191_v26 = vld [vmem:[#allocation7 + $0x70] sm:$0xff]  ;;  %v192_v27 = vld [vmem:[#allocation7 + $0x78] sm:$0xff] }
  0x50   :  { %527 = vmatprep.subr.bf16.mxu1 %v526_v9  ;;  %446 = vmatmul.mubr.msk.f32.vlgmr.msra.gmra.mrb[0].mxu0 %vm93_vm0, %v83_v12  ;;  %v546_v25 = vpack.c.bf16 %v190_v24, %v189_v23  ;;  %v550_v28 = vpack.c.bf16 %v192_v27, %v191_v26  ;;  %v277_v29 = vld [vmem:[#allocation8] sm:$0xff]  ;;  %v278_v30 = vld [vmem:[#allocation8 + $0x8] sm:$0xff]  ;;  %v279_v31 = vld [vmem:[#allocation8 + $0x10] sm:$0xff] }
  0x51   :  { %v554_v32 = vpack.c.bf16 %v278_v30, %v277_v29  ;;  %v280_v33 = vld [vmem:[#allocation8 + $0x18] sm:$0xff]  ;;  %v281_v35 = vld [vmem:[#allocation8 + $0x20] sm:$0xff]  ;;  %v282_v36 = vld [vmem:[#allocation8 + $0x28] sm:$0xff] }
  0x52   :  { %v558_v34 = vpack.c.bf16 %v280_v33, %v279_v31  ;;  %v562_v37 = vpack.c.bf16 %v282_v36, %v281_v35  ;;  %v283_v38 = vld [vmem:[#allocation8 + $0x30] sm:$0xff]  ;;  %v284_v39 = vld [vmem:[#allocation8 + $0x38] sm:$0xff]  ;;  %v285_v41 = vld [vmem:[#allocation8 + $0x40] sm:$0xff] }
  0x53   :  { %529 = vmatpush3.bf16.msra.mxu1 %v526_v9  ;;  %555 = vmatprep.subr.bf16.mxu0 %v554_v32  ;;  %v566_v40 = vpack.c.bf16 %v284_v39, %v283_v38  ;;  %v286_v42 = vld [vmem:[#allocation8 + $0x48] sm:$0xff]  ;;  %v287_v44 = vld [vmem:[#allocation8 + $0x50] sm:$0xff]  ;;  %v288_v45 = vld [vmem:[#allocation8 + $0x58] sm:$0xff] }
  0x54   :  { %531 = vmatprep.subr.bf16.mxu1 %v530_v13  ;;  %557 = vmatpush3.bf16.msra.mxu0 %v554_v32  ;;  %v570_v43 = vpack.c.bf16 %v286_v42, %v285_v41  ;;  %v574_v46 = vpack.c.bf16 %v288_v45, %v287_v44  ;;  %v289_v47 = vld [vmem:[#allocation8 + $0x60] sm:$0xff]  ;;  %v290_v48 = vld [vmem:[#allocation8 + $0x68] sm:$0xff]  ;;  %v291_v57 = vld [vmem:[#allocation8 + $0x70] sm:$0xff] }
  0x55   :  { %559 = vmatprep.subr.bf16.mxu0 %v558_v34  ;;  %v578_v49 = vpack.c.bf16 %v290_v48, %v289_v47  ;;  %v396_v50 = vld [vmem:[%s860_s2] ss:$0 sm:$0xff]  ;;  %v292_v58 = vld [vmem:[#allocation8 + $0x78] sm:$0xff] }
  0x56   :  { %v582_v59 = vpack.c.bf16 %v292_v58, %v291_v57  ;;  %v399_v60 = vld [vmem:[%s862_s4] ss:$0 sm:$0xff]  ;;  %s681_s4 = scalar_lea.vmem %s383_s9, 256 }
  0x57   :  { %533 = vmatpush3.bf16.msra.mxu1 %v530_v13  ;;  %v400_v3 = vld [vmem:[%s864_s6] ss:$0 sm:$0xff]  ;;  %p682_p4 = scmp.ne.s32.totalorder %s383_s9, %s681_s4  ;;  %p687_p6 = scmp.lt.s32.totalorder %s681_s4, %s681_s4 }
  0x58   :  { %535 = vmatprep.subr.bf16.mxu1 %v534_v16  ;;  %561 = vmatpush3.bf16.msra.mxu0 %v558_v34 }
  0x59   :  { %563 = vmatprep.subr.bf16.mxu0 %v562_v37  ;;  %p688_p7 = por %p687_p6, %p686_p5 }
  0x5b   :  { %537 = vmatpush3.bf16.msra.mxu1 %v534_v16  ;;  %p689_p8 = pnand %p688_p7, %p682_p4 }
  0x5c   :  { %539 = vmatprep.subr.bf16.mxu1 %v538_v19  ;;  %565 = vmatpush3.bf16.msra.mxu0 %v562_v37 }
  0x5d   :  { %567 = vmatprep.subr.bf16.mxu0 %v566_v40 }
  0x5f   :  { %541 = vmatpush3.bf16.msra.mxu1 %v538_v19 }
  0x60   :  { %543 = vmatprep.subr.bf16.mxu1 %v542_v22  ;;  %569 = vmatpush3.bf16.msra.mxu0 %v566_v40 }
  0x61   :  { %571 = vmatprep.subr.bf16.mxu0 %v570_v43 }
  0x63   :  { %545 = vmatpush3.bf16.msra.mxu1 %v542_v22 }
  0x64   :  { %547 = vmatprep.subr.bf16.mxu1 %v546_v25  ;;  %573 = vmatpush3.bf16.msra.mxu0 %v570_v43 }
  0x65   :  { %575 = vmatprep.subr.bf16.mxu0 %v574_v46 }
  0x67   :  { %549 = vmatpush3.bf16.msra.mxu1 %v546_v25 }
  0x68   :  { %551 = vmatprep.subr.bf16.mxu1 %v550_v28  ;;  %577 = vmatpush3.bf16.msra.mxu0 %v574_v46 }
  0x69   :  { %579 = vmatprep.subr.bf16.mxu0 %v578_v49 }
  0x6b   :  { %553 = vmatpush3.bf16.msra.mxu1 %v550_v28 }
  0x6c   :  { %581 = vmatpush3.bf16.msra.mxu0 %v578_v49 }
  0x6d   :  { %583 = vmatprep.subr.bf16.mxu0 %v582_v59 }
  0x70   :  { %585 = vmatpush3.bf16.msra.mxu0 %v582_v59 }
 0x123   :  { %v447_v51 = vpop.f32.mrb[0].mxu0 }
 0x124   :  { %v172_v52 = vadd.f32 %v447_v51, %v396_v50  ;;  %v166_v53 = vpop.f32.mrb[1].mxu0 }
 0x125   :  { %v167_v54 = vadd.f32 %v396_v50, %v166_v53 }
 0x126   :  { %v176_v56 = vmax.f32 %v172_v52, 0.0 }
 0x127   :  { %v175_v55 = vmax.f32 %v167_v54, 0.0 }
 0x129   :  { %480 = vmatprep.mubr.f32.mxu1 %v175_v55 }
 0x12a   :  { %481 = vmatmul.mubr.f32.vlgmr.msra.gmra.mrb[0].mxu1 %v176_v56 }
 0x1fd   :  { %v482_v61 = vpop.f32.mrb[0].mxu1 }
 0x1fe   :  { %v272_v62 = vadd.f32 %v482_v61, %v399_v60  ;;  %v266_v63 = vpop.f32.mrb[1].mxu1 }
 0x1ff   :  { %v267_v0 = vadd.f32 %v399_v60, %v266_v63 }
 0x200   :  { %v276_v2 = vmax.f32 %v272_v62, 0.0 }
 0x201   :  { %v275_v1 = vmax.f32 %v267_v0, 0.0 }
 0x203   :  { %515 = vmatprep.mubr.f32.mxu0 %v275_v1 }
 0x204   :  { %516 = vmatmul.mubr.f32.vlgmr.msra.gmra.mrb[2].mxu0 %v276_v2 }
 0x2d7   :  { %v517_v4 = vpop.f32.mrb[2].mxu0 }
 0x2d8   :  { %v372_v5 = vadd.f32 %v517_v4, %v400_v3  ;;  %v366_v6 = vpop.f32.mrb[3].mxu0 }
 0x2d9   :  { %v367_v7 = vadd.f32 %v400_v3, %v366_v6 }
 0x2da   :  { %376 = vst [vmem:[#allocation10 + $0x8] sm:$0xff] %v372_v5 }
 0x2db   :  { %375 = vst [vmem:[#allocation10] sm:$0xff] %v367_v7 }
 0x2dc   :  { %692 = shalt.err (!%p689_p8)
}
 0x2dd   :  { %s693_s6 = scalar_lea.hbm %s865_s7, 256 }
 0x2de   :  { %p694_p9 = scmp.ne.s32.totalorder %s865_s7, %s693_s6  ;;  %p697_p10 = scmp.lt.u32.totalorder %s693_s6, %s865_s7 }
 0x2e0   :  { %p699_p11 = pnand %p697_p10, %p694_p9 }
 0x2e2   :  { %702 = shalt.err (!%p699_p11)
}
 0x2e3   :  { %388 = dma.vmem_to_hbm [thread:$0]  %s383_s9, 256, %s865_s7, [#allocation4], %s713_s13, %s713_s13, %s714_s14  }
 0x2e4   :  { %709 = dma.done.wait [#allocation4], 256  }
 0x2e5   :  { %710 = vsyncadd [#allocation4], 4294967040 }
 0x2e6   :  { %392 = vsyncpa [#allocation3], 1 }
 0x2e7   :  { %393 = vsyncpa [#allocation6], 1 }
 0x2e8   :  { %394 = vsyncpa [#allocation9], 1 }
 0x2e9   :  { %395 = vsyncpa [#allocation4], 1 }

</bundles_post_ra>
